<compile_context>
chip_gen: v6e
topology: v6e:2x2x1
jax: 0.10.0
libtpu: 0.0.40
codegen_flags: <defaults>
</compile_context>

<pallas_src>
import functools

import jax
import jax.numpy as jnp
from jax.experimental import pallas as pl
from jax.experimental.pallas import tpu as pltpu


def _affine_grid_kernel(theta_ref, out_ref, *, out_h, out_w, use_mxu):
    """One grid step: b_blk batch rows x one lane-dense chunk of the flat grid.

    theta_ref : VMEM (b_blk, 8)     -- [t00,t01,t02,t10,t11,t12, 0, 0] per row
    out_ref   : VMEM (b_blk, CHUNK) -- interleaved [x, y] pairs, row-major (H, W, 2)
    """
    chunk = out_ref.shape[1]
    c = pl.program_id(1)

    # Flat index k over (H, W, 2): k = (i*W + j)*2 + sel, offset by chunk index.
    k = jax.lax.broadcasted_iota(jnp.int32, (1, chunk), 1) + c * chunk
    sel = k & 1                       # 0 -> x coordinate, 1 -> y coordinate
    p_f = (k >> 1).astype(jnp.float32)  # pixel index i*W + j

    # Recover (i, j) with exact float math (guarded: H*W < 2**22 so the +0.5
    # margin dominates the rounding of 1/W). Avoids vector integer div/mod.
    i_f = jnp.floor((p_f + 0.5) * (1.0 / out_w))
    j_f = p_f - i_f * out_w

    # align_corners=False base grid, as FMAs with Python-folded constants.
    x = j_f * (2.0 / out_w) + (1.0 / out_w - 1.0)   # (1, chunk)
    y = i_f * (2.0 / out_h) + (1.0 / out_h - 1.0)   # (1, chunk)

    t = theta_ref[...]                               # (b_blk, 8) f32

    if use_mxu:
        # (8, chunk) basis: rows [x*(1-s), y*(1-s), (1-s), x*s, y*s, s, 0, 0].
        # Built once per step on the VPU, amortized over b_blk rows; the
        # matmul lands on the otherwise-idle MXU and writes the (b_blk, chunk)
        # output layout directly.
        sel_f = sel.astype(jnp.float32)              # (1, chunk)
        row = jax.lax.broadcasted_iota(jnp.int32, (8, chunk), 0)
        rm = jnp.where(row >= 3, row - 3, row)
        coef = jnp.where(rm == 0, x, jnp.where(rm == 1, y, 1.0))
        gate = jnp.where(row < 3, 1.0 - sel_f,
                         jnp.where(row < 6, sel_f, 0.0))
        basis = coef * gate                          # (8, chunk)
        out = jnp.dot(t, basis, preferred_element_type=jnp.float32,
                      precision=jax.lax.Precision.HIGHEST)
    else:
        # Coefficient selection: pick the (x|y)-row coefficients per lane, then
        # a single affine evaluation (no compute-both-then-discard).
        is_y = sel == 1                              # (1, chunk)
        c0 = jnp.where(is_y, t[:, 3:4], t[:, 0:1])   # (b_blk, chunk)
        c1 = jnp.where(is_y, t[:, 4:5], t[:, 1:2])
        c2 = jnp.where(is_y, t[:, 5:6], t[:, 2:3])
        out = c0 * x + c1 * y + c2

    out_ref[...] = out.astype(out_ref.dtype)


def _choose_chunk(flat_len, max_chunk, min_chunks):
    """Largest lane-dense (multiple-of-128) divisor of flat_len that is
    <= max_chunk and leaves at least min_chunks chunks; else the full row."""
    if flat_len % 128 != 0:
        return flat_len                       # only the full row is legal
    cap = max_chunk if min_chunks <= 1 else min(max_chunk, flat_len // min_chunks)
    cap = max(cap, 128)
    m = flat_len // 128
    best = 1
    d = 1
    while d * d <= m:
        if m % d == 0:
            for cand in (d, m // d):
                if cand * 128 <= cap and cand > best:
                    best = cand
        d += 1
    return best * 128


def affine_grid_gen(theta, out_h=240, out_w=240, out_ch=3):
    """JAX/Pallas equivalent of AffineGridGen.forward.

    out_ch only affects the declared torch.Size in PyTorch; the returned grid
    does not depend on it (kept for interface fidelity).
    """
    del out_ch
    theta = jnp.asarray(theta)
    out_dtype = (theta.dtype if jnp.issubdtype(theta.dtype, jnp.floating)
                 else jnp.float32)
    theta = theta.astype(jnp.float32).reshape(-1, 2, 3)
    b = theta.shape[0]

    if out_h * out_w >= (1 << 22):
        raise ValueError(
            "affine_grid_gen: out_h*out_w must be < 2**22 for the exact "
            "float32 index-recovery path.")

    # Pad the 6 affine params to 8 columns (sublane-aligned K for the MXU path;
    # the extra columns multiply all-zero basis rows so they never contribute).
    theta_flat = jnp.pad(theta.reshape(b, 6), ((0, 0), (0, 2)))

    flat = out_h * out_w * 2
    itemsize = jnp.dtype(out_dtype).itemsize
    pack = 16 if out_dtype == jnp.bfloat16 else 8   # sublane packing per vreg

    # Batch block: never pad, never slice. Either a multiple-of-pack divisor of
    # b, or the full batch dim (a full-extent block is always legal).
    if b % pack == 0:
        b_blk = pack
        while b_blk * 2 <= 64 and b % (b_blk * 2) == 0:
            b_blk *= 2
    else:
        b_blk = b
    n_b_blocks = b // b_blk

    # Fat, lane-dense chunks of the flat (H*W*2) row: ~4 MiB per output block
    # (8 MiB double-buffered -> well under every chip's scoped-VMEM default,
    # v7x included). Keep >= 2 total grid steps so v7x's two TensorCores both
    # get work under dimension_semantics=("parallel", "parallel").
    block_budget_bytes = 4 * 1024 * 1024
    max_chunk = max(block_budget_bytes // (itemsize * b_blk), 128)
    min_chunks = 1 if n_b_blocks >= 2 else 2
    chunk = _choose_chunk(flat, max_chunk, min_chunks)
    n_chunks = flat // chunk

    # MXU path only pays off when the basis build is amortized over >= 8 rows.
    use_mxu = b_blk >= 8

    kernel = functools.partial(_affine_grid_kernel, out_h=out_h, out_w=out_w,
                               use_mxu=use_mxu)

    out = pl.pallas_call(
        kernel,
        out_shape=jax.ShapeDtypeStruct((b, flat), out_dtype),
        grid_spec=pltpu.PrefetchScalarGridSpec(
            num_scalar_prefetch=0,
            grid=(n_b_blocks, n_chunks),
            in_specs=[pl.BlockSpec((b_blk, 8), lambda i, c: (i, 0))],
            # NOTE: could sweep pipeline_mode=pl.Buffered(3) here once blocks
            # are large; left at the default 2-deep buffer for safety.
            out_specs=pl.BlockSpec((b_blk, chunk), lambda i, c: (i, c)),
        ),
        compiler_params=pltpu.CompilerParams(
            dimension_semantics=("parallel", "parallel")),
    )(theta_flat)

    # Free, contiguity-preserving reshape to the F.affine_grid layout.
    return out.reshape(b, out_h, out_w, 2)


def _affine_grid_ref(theta, out_h, out_w):
    """Pure-JAX elementwise reference (align_corners=False), exact in f32."""
    theta = jnp.asarray(theta, dtype=jnp.float32).reshape(-1, 2, 3)
    xs = (2.0 * jnp.arange(out_w, dtype=jnp.float32) + 1.0) / out_w - 1.0
    ys = (2.0 * jnp.arange(out_h, dtype=jnp.float32) + 1.0) / out_h - 1.0
    yy, xx = jnp.meshgrid(ys, xs, indexing="ij")                 # (H, W)
    t = theta[:, None, None, :, :]                               # (B,1,1,2,3)
    gx = t[..., 0, 0] * xx + t[..., 0, 1] * yy + t[..., 0, 2]
    gy = t[..., 1, 0] * xx + t[..., 1, 1] * yy + t[..., 1, 2]
    return jnp.stack([gx, gy], axis=-1)                          # (B, H, W, 2)


if __name__ == "__main__":
    key = jax.random.PRNGKey(0)

    # Small config consistent with the module (B=2: full-batch block, VPU path).
    theta_small = jax.random.normal(key, (2, 2, 3), dtype=jnp.float32)
    g = jax.block_until_ready(
        affine_grid_gen(theta_small, out_h=16, out_w=16, out_ch=3))
    assert g.shape == (2, 16, 16, 2), g.shape
    assert jnp.allclose(g, _affine_grid_ref(theta_small, 16, 16),
                        atol=1e-5, rtol=1e-5), "mismatch (16x16)"

    # Module defaults (240x240): exercises the fat lane-dense chunked path
    # (2 chunks of 57600 elements), no padding / no post-slice.
    g2 = jax.block_until_ready(
        affine_grid_gen(theta_small, out_h=240, out_w=240, out_ch=3))
    assert g2.shape == (2, 240, 240, 2), g2.shape
    assert jnp.allclose(g2, _affine_grid_ref(theta_small, 240, 240),
                        atol=1e-5, rtol=1e-5), "mismatch (240x240)"

    # Batch = 10 (not a multiple of 8): full-batch block, no padding, MXU path.
    theta_10 = jax.random.normal(jax.random.PRNGKey(0), (10, 2, 3),
                                 dtype=jnp.float32)
    g3 = jax.block_until_ready(
        affine_grid_gen(theta_10, out_h=16, out_w=16, out_ch=3))
    assert g3.shape == (10, 16, 16, 2), g3.shape
    assert jnp.allclose(g3, _affine_grid_ref(theta_10, 16, 16),
                        atol=1e-5, rtol=1e-5), "mismatch (B=10)"

    # Batch = 16 (multiple of the sublane pack): 16-row blocks, MXU path.
    theta_16 = jax.random.normal(jax.random.PRNGKey(0), (16, 2, 3),
                                 dtype=jnp.float32)
    g4 = jax.block_until_ready(
        affine_grid_gen(theta_16, out_h=16, out_w=16, out_ch=3))
    assert g4.shape == (16, 16, 16, 2), g4.shape
    assert jnp.allclose(g4, _affine_grid_ref(theta_16, 16, 16),
                        atol=1e-5, rtol=1e-5), "mismatch (B=16)"

    print("KERNEL_OK")
</pallas_src>

<mosaic_0001>
module attributes {stable_mosaic.version = 11 : i64} {
  func.func @_affine_grid_kernel(%arg0: i32, %arg1: i32, %arg2: memref<2x8xf32, #tpu.memory_space<vmem>>, %arg3: memref<2x256xf32, #tpu.memory_space<vmem>>) attributes {dimension_semantics = [#tpu.dimension_semantics<parallel>, #tpu.dimension_semantics<parallel>], iteration_bounds = array<i64: 1, 2>, scalar_prefetch = 0 : i64, scratch_operands = 0 : i64, tpu.core_type = #tpu.core_type<tc>, window_params = [{transform_indices = @transform_0, window_bounds = array<i64: 2, 8>}, {transform_indices = @transform_1, window_bounds = array<i64: 2, 256>}]} {
    %0 = tpu.iota {dimensions = array<i32: 1>} : vector<1x256xi32>
    %c256_i32 = arith.constant 256 : i32
    %1 = arith.muli %arg1, %c256_i32 : i32
    %2 = vector.broadcast %1 : i32 to vector<1x256xi32>
    %3 = arith.addi %0, %2 : vector<1x256xi32>
    %c1_i32 = arith.constant 1 : i32
    %4 = vector.broadcast %c1_i32 : i32 to vector<1x256xi32>
    %5 = arith.andi %3, %4 : vector<1x256xi32>
    %c1_i32_0 = arith.constant 1 : i32
    %6 = vector.broadcast %c1_i32_0 : i32 to vector<1x256xi32>
    %7 = arith.shrsi %3, %6 : vector<1x256xi32>
    %8 = arith.sitofp %7 : vector<1x256xi32> to vector<1x256xf32>
    %cst = arith.constant 5.000000e-01 : f32
    %9 = vector.broadcast %cst : f32 to vector<1x256xf32>
    %10 = arith.addf %8, %9 : vector<1x256xf32>
    %cst_1 = arith.constant 6.250000e-02 : f32
    %11 = vector.broadcast %cst_1 : f32 to vector<1x256xf32>
    %12 = arith.mulf %10, %11 : vector<1x256xf32>
    %13 = math.floor %12 : vector<1x256xf32>
    %cst_2 = arith.constant 1.600000e+01 : f32
    %14 = vector.broadcast %cst_2 : f32 to vector<1x256xf32>
    %15 = arith.mulf %13, %14 : vector<1x256xf32>
    %16 = arith.subf %8, %15 : vector<1x256xf32>
    %cst_3 = arith.constant 1.250000e-01 : f32
    %17 = vector.broadcast %cst_3 : f32 to vector<1x256xf32>
    %18 = arith.mulf %16, %17 : vector<1x256xf32>
    %cst_4 = arith.constant -9.375000e-01 : f32
    %19 = vector.broadcast %cst_4 : f32 to vector<1x256xf32>
    %20 = arith.addf %18, %19 : vector<1x256xf32>
    %cst_5 = arith.constant 1.250000e-01 : f32
    %21 = vector.broadcast %cst_5 : f32 to vector<1x256xf32>
    %22 = arith.mulf %13, %21 : vector<1x256xf32>
    %cst_6 = arith.constant -9.375000e-01 : f32
    %23 = vector.broadcast %cst_6 : f32 to vector<1x256xf32>
    %24 = arith.addf %22, %23 : vector<1x256xf32>
    %c0 = arith.constant 0 : index
    %c0_7 = arith.constant 0 : index
    %25 = vector.load %arg2[%c0, %c0_7] : memref<2x8xf32, #tpu.memory_space<vmem>>, vector<2x8xf32>
    %c1_i32_8 = arith.constant 1 : i32
    %26 = vector.broadcast %c1_i32_8 : i32 to vector<1x256xi32>
    %27 = arith.cmpi eq, %5, %26 : vector<1x256xi32>
    %28 = vector.extract_strided_slice %25 {offsets = [0, 3], sizes = [2, 1], strides = [1, 1]} : vector<2x8xf32> to vector<2x1xf32>
    %29 = vector.extract_strided_slice %25 {offsets = [0, 0], sizes = [2, 1], strides = [1, 1]} : vector<2x8xf32> to vector<2x1xf32>
    %30 = vector.shape_cast %27 : vector<1x256xi1> to vector<1x256xi1>
    %31 = vector.broadcast %30 : vector<1x256xi1> to vector<2x256xi1>
    %32 = vector.shape_cast %28 : vector<2x1xf32> to vector<2x1xf32>
    %33 = vector.broadcast %32 : vector<2x1xf32> to vector<2x256xf32>
    %34 = vector.shape_cast %29 : vector<2x1xf32> to vector<2x1xf32>
    %35 = vector.broadcast %34 : vector<2x1xf32> to vector<2x256xf32>
    %36 = arith.select %31, %33, %35 : vector<2x256xi1>, vector<2x256xf32>
    %37 = vector.extract_strided_slice %25 {offsets = [0, 4], sizes = [2, 1], strides = [1, 1]} : vector<2x8xf32> to vector<2x1xf32>
    %38 = vector.extract_strided_slice %25 {offsets = [0, 1], sizes = [2, 1], strides = [1, 1]} : vector<2x8xf32> to vector<2x1xf32>
    %39 = vector.shape_cast %27 : vector<1x256xi1> to vector<1x256xi1>
    %40 = vector.broadcast %39 : vector<1x256xi1> to vector<2x256xi1>
    %41 = vector.shape_cast %37 : vector<2x1xf32> to vector<2x1xf32>
    %42 = vector.broadcast %41 : vector<2x1xf32> to vector<2x256xf32>
    %43 = vector.shape_cast %38 : vector<2x1xf32> to vector<2x1xf32>
    %44 = vector.broadcast %43 : vector<2x1xf32> to vector<2x256xf32>
    %45 = arith.select %40, %42, %44 : vector<2x256xi1>, vector<2x256xf32>
    %46 = vector.extract_strided_slice %25 {offsets = [0, 5], sizes = [2, 1], strides = [1, 1]} : vector<2x8xf32> to vector<2x1xf32>
    %47 = vector.extract_strided_slice %25 {offsets = [0, 2], sizes = [2, 1], strides = [1, 1]} : vector<2x8xf32> to vector<2x1xf32>
    %48 = vector.shape_cast %27 : vector<1x256xi1> to vector<1x256xi1>
    %49 = vector.broadcast %48 : vector<1x256xi1> to vector<2x256xi1>
    %50 = vector.shape_cast %46 : vector<2x1xf32> to vector<2x1xf32>
    %51 = vector.broadcast %50 : vector<2x1xf32> to vector<2x256xf32>
    %52 = vector.shape_cast %47 : vector<2x1xf32> to vector<2x1xf32>
    %53 = vector.broadcast %52 : vector<2x1xf32> to vector<2x256xf32>
    %54 = arith.select %49, %51, %53 : vector<2x256xi1>, vector<2x256xf32>
    %55 = vector.broadcast %20 : vector<1x256xf32> to vector<2x256xf32>
    %56 = arith.mulf %36, %55 : vector<2x256xf32>
    %57 = vector.broadcast %24 : vector<1x256xf32> to vector<2x256xf32>
    %58 = arith.mulf %45, %57 : vector<2x256xf32>
    %59 = arith.addf %56, %58 : vector<2x256xf32>
    %60 = arith.addf %59, %54 : vector<2x256xf32>
    %c0_9 = arith.constant 0 : index
    %c0_10 = arith.constant 0 : index
    %61 = vector.load %arg3[%c0_9, %c0_10] : memref<2x256xf32, #tpu.memory_space<vmem>>, vector<2x256xf32>
    tpu.vector_store %arg3[%c0_9, %c0_10], %60 {strides = array<i32>} : memref<2x256xf32, #tpu.memory_space<vmem>>, vector<2x256xf32>,
    return
  }
  func.func @transform_0(%arg0: i32, %arg1: i32) -> (i32, i32) {
    %c0_i32 = arith.constant 0 : i32
    %c0_i32_0 = arith.constant 0 : i32
    return %arg0, %c0_i32 : i32, i32
  }
  func.func @transform_1(%arg0: i32, %arg1: i32) -> (i32, i32) {
    %c0_i32 = arith.constant 0 : i32
    return %arg0, %arg1 : i32, i32
  }
}

</mosaic_0001>

<bundles_post_ra>
// kernel: tpu_custom_call.1
= control target key start
LH: loop header
LB: loop body
LE: loop exit
PB: predicated region body
PF: predicated region fallthrough
CT: control target
= control target key end

     0   :  { %6 = vsyncpa [#allocation3], 0  ;;  %s667_s0 = inlined_call_operand.hbm [shape: f32[2,8], index: 0, kind: input, shape index: {}]   ;;  %s668_s1 = inlined_call_operand.hbm [shape: f32[2,512], index: 1, kind: output, shape index: {}]  }
   0x1   :  { %7 = vsyncpa [#allocation4], 0 }
   0x2   :  { %9 = vsyncpa [#allocation4 + $0x1], 0  ;;  %s527_s6 = smov 0   ;;  %s529_s7 = smov 0  }
   0x3   :  { %s531_s8 = smov 0   ;;  %s533_s9 = smov 0  }
   0x4   :  { %s535_s10 = smov 0   ;;  %s537_s11 = smov 0  }
   0x5 LB: > { %s308_s12 = sadd.s32 4294967295, %s507_s11   ;;  %s309_s13 = sadd.s32 4294967294, %s507_s11   ;;  %s507_s11 = sphi %s537_s11, %s15_s11   ;;  %s503_s10 = sphi %s535_s10, %s681_s10   ;;  %s499_s9 = sphi %s533_s9, %s680_s9   ;;  %s495_s8 = sphi %s531_s8, %s679_s8   ;;  %s491_s7 = sphi %s529_s7, %s678_s7   ;;  %s487_s6 = sphi %s527_s6, %s677_s6  }
   0x6   : > { %s24_s14 = sadd.s32 1, %s503_s10  ;;  %s62_s15 = sadd.s32 1, %s495_s8 }
   0x7   : > { %p25_p0 = scmp.ge.s32.totalorder %s24_s14, 2  ;;  %p72_p1 = scmp.ne.s32.totalorder %s495_s8, %s491_s7 }
   0x8   : > { %p73_p2 = scmp.eq.s32.totalorder %s308_s12, 1  ;;  %p78_p3 = scmp.ne.s32.totalorder %s491_s7, %s487_s6 }
   0x9   : > { %s683_s14 = smov (%p25_p0, %s24_s14), 0  ;;  %p79_p5 = scmp.eq.s32.totalorder %s309_s13, 1 }
   0xa   : > { %p567_p4 = por %p73_p2, %p72_p1  ;;  %s58_s17 = ssub.s32 %s503_s10, %s683_s14 }
   0xb   : > { %p310_p6 = scmp.ge.s32.totalorder %s507_s11, 1  ;;  %p60_p7 = scmp.eq.s32.totalorder %s58_s17, 0 }
   0xc   : > { %p574_p8 = por %p79_p5, %p78_p3  ;;  %p86_p9 = scmp.lt.s32.totalorder %s507_s11, 3 }
   0xd   : > { %s580_s19 = scalar_select %p60_p7, %s495_s8, %s62_s15  }
   0xe   : > { %p582_p10 = pnand %p310_p6, %p86_p9  ;;  %p586_p11 = scmp.eq.s32.totalorder %s308_s12, 0 }
   0xf   : > { %s509_s22 = smov [#allocation2]  }
  0x10   : > { %p329_p12 = pneg %p582_p10  ;;  %s101_s23 = sshll.u32 %s509_s22, 4  ;;  %s102_s23 = int_to_ptr.vmem [resolvable:$true] %s101_s23 }
  0x11   : > { %s412_s24 = scalar_lea.vmem %s102_s23, 32  ;;  %p420_p5 = scmp.lt.s32.totalorder %s102_s23, %s102_s23 }
  0x12   : > { %p330_p13 = pnand %p586_p11, %p329_p12  ;;  %p413_p1 = scmp.ne.s32.totalorder %s102_s23, %s412_s24 }
  0x13   : > { %p421_p6 = scmp.lt.s32.totalorder %s412_s24, %s412_s24 }
  0x14   : > { %p403_p0 = pneg %p330_p13 }
  0x15   : > { %p422_p7 = por %p421_p6, %p420_p5 }
  0x16   : > { %p415_p2 = pnand %p413_p1, %p403_p0 }
  0x18   : > { %p416_p3 = pneg %p415_p2 }
  0x1a   : > { %p423_p9 = pnand %p422_p7, %p416_p3 }
  0x1c   : > { %426 = shalt.err (!%p423_p9)
}
  0x1d   : > { %332 = dma.hbm_to_vmem [thread:$0]  (!%p330_p13), %s667_s0, 32, %s102_s23, [#allocation3]  }
  0x1e   : > { %114 = sbr.rel (%p582_p10) target bundleno = 190 (0xbe), region = 24 }
  0x23   : > { %478 = dma.done.wait (%p586_p11), [#allocation3], 32  }
  0x24   : > { %480 = vsyncadd (%p586_p11), [#allocation3], 4294967264  ;;  %v510_v0 = vmov 4   ;;  %v511_v1 = vmov 3   ;;  %v161_v2 = vld [vmem:[#allocation2] sm:$0x3]  ;;  %v130_v7 = vlaneseq }
  0x25   : > { %397 = vset.pattern.permute.xlu1 %v510_v0  ;;  %395 = vset.pattern.permute.xlu0 %v511_v1  ;;  %v512_v3 = vmov 1   ;;  %v513_v4 = vmov 0   ;;  %v514_v5 = vmov 5   ;;  %v515_v6 = vmov 2   ;;  %s315_s27 = sshll.u32 %s499_s9, 8  ;;  %s126_s28 = sand.u32 1, %s491_s7  }
  0x26   : > { %180 = vperm.xlu1 %397, %v161_v2   ;;  %170 = vperm.xlu0 %395, %v161_v2   ;;  %v131_v8 = vand.u32 127, %v130_v7  ;;  %v134_v10 = vstv %s315_s27  ;;  %s314_s29 = sshll.u32 %s126_s28, 2  ;;  %s322_s30 = sshll.u32 %s499_s9, 6 }
  0x27   : > { %s128_s2 = scalar_lea.vmem [#allocation5], %s314_s29  ;;  %s234_s12 = scalar_lea.hbm %s668_s1, %s322_s30 }
  0x28   : > { %v132_v9 = vadd.s32 128, %v131_v8  ;;  %v135_v11 = vadd.s32 %v134_v10, %v131_v8  ;;  %s236_s3 = sshll.u32 %s128_s2, 4  ;;  %s220_s13 = scalar_lea.sflag [#allocation4], %s126_s28  ;;  %s237_s3 = int_to_ptr.vmem [resolvable:$true] %s236_s3 }
  0x29   : > { %s427_s15 = scalar_lea.vmem %s237_s3, 64  ;;  %s516_s17 = smov [#allocation5]  }
  0x2a   : > { %398 = vset.pattern.permute.xlu1 %v512_v3  ;;  %396 = vset.pattern.permute.xlu0 %v513_v4  ;;  %v136_v12 = vadd.s32 %v134_v10, %v132_v9  ;;  %v139_v13 = vshra.s32 %v135_v11, 1  ;;  %v137_v27 = vand.u32 1, %v135_v11  ;;  %p428_p10 = scmp.ne.s32.totalorder %s237_s3, %s427_s15  ;;  %s431_s9 = sshll.u32 %s516_s17, 4  ;;  %s432_s9 = int_to_ptr.vmem [resolvable:$false] %s431_s9 }
  0x2b   : > { %184 = vperm.xlu1 %398, %v161_v2   ;;  %174 = vperm.xlu0 %396, %v161_v2   ;;  %s433_s20 = scalar_lea.vmem %s432_s9, 128  ;;  %p434_p13 = scmp.lt.s32.totalorder %s237_s3, %s432_s9 }
  0x2c   : > { %v140_v14 = vshra.s32 %v136_v12, 1  ;;  %v141_v15 = vcvt.s32.f32 %v139_v13  ;;  %v138_v28 = vand.u32 1, %v136_v12  ;;  %vm604_vm0 = vcmp.eq.s32.totalorder %v137_v27, 1  ;;  %p429_p11 = pnand %p428_p10, %p567_p4  ;;  %p435_p0 = scmp.lt.s32.totalorder %s433_s20, %s427_s15 }
  0x2e   : > { %v142_v16 = vcvt.s32.f32 %v140_v14  ;;  %v143_v17 = vadd.f32 0.5, %v141_v15  ;;  %vm608_vm1 = vcmp.eq.s32.totalorder %v138_v28, 1  ;;  %p430_p12 = pneg %p429_p11  ;;  %p436_p1 = por %p435_p0, %p434_p13 }
  0x2f   : > { %399 = vset.pattern.permute.xlu1 %v514_v5  ;;  %400 = vset.pattern.permute.xlu0 %v515_v6 }
  0x30   : > { %190 = vperm.xlu1 %399, %v161_v2   ;;  %194 = vperm.xlu0 %400, %v161_v2   ;;  %v144_v18 = vadd.f32 0.5, %v142_v16  ;;  %v145_v19 = vmul.f32 0.0625, %v143_v17  ;;  %p437_p2 = pnand %p436_p1, %p430_p12 }
  0x32   : > { %v146_v20 = vmul.f32 0.0625, %v144_v18  ;;  %v147_v21 = vfloor.f32 %v145_v19 }
  0x34   : > { %v148_v22 = vfloor.f32 %v146_v20  ;;  %v149_v23 = vmul.f32 16.0, %v147_v21  ;;  %v157_v29 = vmul.f32 0.125, %v147_v21 }
  0x36   : > { %v150_v24 = vmul.f32 16.0, %v148_v22  ;;  %v151_v25 = vsub.f32 %v141_v15, %v149_v23  ;;  %v158_v30 = vmul.f32 0.125, %v148_v22  ;;  %v159_v37 = vadd.f32 -0.9375, %v157_v29 }
  0x38   : > { %v152_v26 = vsub.f32 %v142_v16, %v150_v24  ;;  %v153_v31 = vmul.f32 0.125, %v151_v25  ;;  %v160_v38 = vadd.f32 -0.9375, %v158_v30 }
  0x3a   : > { %v154_v32 = vmul.f32 0.125, %v152_v26  ;;  %v155_v39 = vadd.f32 -0.9375, %v153_v31 }
  0x3c   : > { %v156_v40 = vadd.f32 -0.9375, %v154_v32 }
  0xa1   : > { %v181_v33 = vpop.permute.xlu1 %180  ;;  %v171_v34 = vpop.permute.xlu0 %170 }
  0xa6   : > { %v185_v41 = vpop.permute.xlu1 %184  ;;  %v175_v42 = vpop.permute.xlu0 %174 }
  0xa7   : > { %v187_v43 = vsel %vm604_vm0, %v181_v33, %v185_v41  ;;  %v188_v44 = vsel %vm608_vm1, %v181_v33, %v185_v41  ;;  %v177_v45 = vsel %vm604_vm0, %v171_v34, %v175_v42  ;;  %v178_v46 = vsel %vm608_vm1, %v171_v34, %v175_v42 }
  0xa8   : > { %v201_v47 = vmul.f32 %v187_v43, %v159_v37  ;;  %v202_v48 = vmul.f32 %v188_v44, %v160_v38  ;;  %v199_v49 = vmul.f32 %v177_v45, %v155_v39  ;;  %v200_v50 = vmul.f32 %v178_v46, %v156_v40 }
  0xaa   : > { %v203_v51 = vadd.f32 %v201_v47, %v199_v49  ;;  %v204_v52 = vadd.f32 %v202_v48, %v200_v50 }
  0xab   : > { %v191_v53 = vpop.permute.xlu1 %190  ;;  %v195_v54 = vpop.permute.xlu0 %194 }
  0xac   : > { %v197_v55 = vsel %vm604_vm0, %v191_v53, %v195_v54  ;;  %v198_v56 = vsel %vm608_vm1, %v191_v53, %v195_v54 }
  0xad   : > { %v205_v57 = vadd.f32 %v203_v51, %v197_v55  ;;  %v206_v58 = vadd.f32 %v204_v52, %v198_v56 }
  0xaf   : > { %v209_v59 = vcombine.low %v205_v57, %v206_v58 }
  0xb1   : > { %316 = vst.sshfl [vmem:[%s128_s2] sm:$0x33 pattern:$0x76325410] %v209_v59 }
  0xb2   : > { %440 = shalt.err (!%p437_p2)
}
  0xb3   : > { %s441_s21 = scalar_lea.hbm %s234_s12, 64  ;;  %s445_s24 = scalar_lea.hbm %s668_s1, 128 }
  0xb4   : > { %p442_p3 = scmp.ne.s32.totalorder %s234_s12, %s441_s21  ;;  %p446_p7 = scmp.lt.s32.totalorder %s234_s12, %s668_s1 }
  0xb5   : > { %p447_p9 = scmp.lt.s32.totalorder %s445_s24, %s441_s21 }
  0xb6   : > { %p443_p5 = pnand %p442_p3, %p567_p4 }
  0xb7   : > { %p448_p10 = por %p447_p9, %p446_p7 }
  0xb8   : > { %p444_p6 = pneg %p443_p5 }
  0xba   : > { %p449_p11 = pnand %p448_p10, %p444_p6 }
  0xbc   : > { %452 = shalt.err (!%p449_p11)
}
  0xbd   : > { %327 = dma.vmem_to_hbm [thread:$0]  (%p567_p4), %s237_s3, 64, %s234_s12, %s220_s13  }
  0xbe PF: > { %p339_p12 = scmp.ge.s32.totalorder %s507_s11, 2  ;;  %s248_s27 = sand.u32 1, %s487_s6  }
  0xbf   : > { %s249_s28 = scalar_lea.sflag [#allocation4], %s248_s27 }
  0xc0   : > { %p334_p13 = pnand %p339_p12, %p574_p8 }
  0xc2   : > { %p335_p0 = pneg %p334_p13 }
  0xc4   : > { %482 = dma.done.wait (%p335_p0), %s249_s28, 64  }
  0xc5   : > { %484 = vsyncadd (%p335_p0), %s249_s28, 4294967232  ;;  %s15_s11 = sadd.s32 1, %s507_s11   ;;  %s677_s6 = smov %s491_s7 }
  0xc6   : > { %p12_p1 = scmp.ge.s32.totalorder %s15_s11, 4   ;;  %s678_s7 = smov %s495_s8 }
  0xc7   : > { %s679_s8 = smov %s580_s19  ;;  %s680_s9 = smov %s503_s10 }
  0xc8   : > { %s681_s10 = smov %s683_s14  ;;  %14 = sbr.rel (!%p12_p1) target bundleno = 5 (0x5), region = 62 }
  0xcd   :  { %254 = vsyncpa [#allocation3], 1 }
  0xce   :  { %256 = vsyncpa [#allocation3 + $0x1], 1 }
  0xcf   :  { %257 = vsyncpa [#allocation4], 1 }
  0xd0   :  { %259 = vsyncpa [#allocation4 + $0x1], 1 }

</bundles_post_ra>
